<compile_context>
chip_gen: v7x
topology: tpu7x:2x2x1
jax: 0.10.0
libtpu: 0.0.40
codegen_flags: <defaults>
</compile_context>

<pallas_src>
import math
import functools

import jax
import jax.numpy as jnp
from jax.experimental import pallas as pl
from jax.experimental.pallas import tpu as pltpu


_VMEM_BUDGET_BYTES = 40 * 1024 * 1024   # conservative across v5e / v6e / v7x
_VMEM_LIMIT_BYTES = 48 * 1024 * 1024    # > v5e 16 MiB scoped default, < v7x 64 MiB physical


def _round_up(n, m):
    return ((n + m - 1) // m) * m


def _pick_tile_b(batch, D, H, itemsize, requested):
    """Largest multiple-of-8 batch tile that fits the VMEM budget."""
    w_bytes = 2 * D * H * itemsize                 # resident W.T (default double-buffer)
    per_row = 2 * D * itemsize + 2 * 4             # double-buffered x row + f32 out row
    budget = max(_VMEM_BUDGET_BYTES - w_bytes, 8 * per_row)
    max_rows = max(8, (budget // per_row) // 8 * 8)
    tb = min(int(requested), int(max_rows), _round_up(batch, 8))
    return max(8, tb)


def _committee_kernel(x_ref, wt_ref, o_ref, *, inv_sqrt_d, inv_h, activation):
    # x_ref : (tb, D)  streamed input tile (bf16 or f32)
    # wt_ref: (D, H)   W.T, constant block (fetched once)
    # o_ref : (tb, 1)  f32 per-sample committee output
    z = jnp.dot(x_ref[...], wt_ref[...], preferred_element_type=jnp.float32)

    if activation == "square":
        a = z * z
        scale = inv_h * inv_sqrt_d * inv_sqrt_d        # (z/sqrt(D))^2 folded into scale
    elif activation == "relu":
        a = jnp.maximum(z, 0.0)
        scale = inv_h * inv_sqrt_d                     # relu is positively homogeneous
    elif activation == "erf":
        a = jax.lax.erf(z * (inv_sqrt_d / math.sqrt(2.0)))
        scale = inv_h
    else:
        raise ValueError(f"unknown activation: {activation}")

    # mean over the hidden (committee) dimension, scale folded in
    o_ref[...] = jnp.sum(a, axis=-1, keepdims=True) * scale


def committee_machine_forward(x, W, *, activation="square", tile_b=512,
                              compute_dtype=jnp.bfloat16):
    """x: (B, input_size); W: (hidden_size, input_size) -> (B,) f32."""
    B, D = x.shape
    H, D_w = W.shape
    assert D == D_w, "weight / input feature mismatch"

    itemsize = jnp.dtype(compute_dtype).itemsize
    tb = _pick_tile_b(B, D, H, itemsize, tile_b)
    B_pad = _round_up(B, tb)

    x_c = x.astype(compute_dtype)
    if B_pad != B:
        x_c = jnp.pad(x_c, ((0, B_pad - B), (0, 0)))   # zero rows, sliced off below
    w_t = W.T.astype(compute_dtype)                    # (D, H)

    kernel = functools.partial(
        _committee_kernel,
        inv_sqrt_d=1.0 / math.sqrt(float(D)),
        inv_h=1.0 / float(H),
        activation=activation,
    )

    out = pl.pallas_call(
        kernel,
        out_shape=jax.ShapeDtypeStruct((B_pad, 1), jnp.float32),
        grid_spec=pltpu.PrefetchScalarGridSpec(
            num_scalar_prefetch=0,
            grid=(B_pad // tb,),
            in_specs=[
                pl.BlockSpec((tb, D), lambda i: (i, 0)),   # streamed x tile
                pl.BlockSpec((D, H), lambda i: (0, 0)),    # resident W.T (constant block)
            ],
            out_specs=pl.BlockSpec((tb, 1), lambda i: (i, 0)),
        ),
        compiler_params=pltpu.CompilerParams(
            dimension_semantics=("parallel",),
            vmem_limit_bytes=_VMEM_LIMIT_BYTES,
        ),
    )(x_c, w_t)

    return out[:B, 0]   # (B,), matches torch.mean(..., axis=-1)


def _reference(x, W, activation="square"):
    D = x.shape[-1]
    z = (x @ W.T) / math.sqrt(float(D))
    if activation == "square":
        a = z * z
    elif activation == "erf":
        a = jax.lax.erf(z / math.sqrt(2.0))
    elif activation == "relu":
        a = jnp.maximum(z, 0.0)
    else:
        raise ValueError(activation)
    return jnp.mean(a, axis=-1)


if __name__ == "__main__":
    key = jax.random.PRNGKey(0)
    k_x, k_w = jax.random.split(key)

    batch = 20            # deliberately not a multiple of 8: exercises batch padding
    input_size = 32
    hidden_size = 16

    x = jax.random.normal(k_x, (batch, input_size), dtype=jnp.float32)
    # Deterministic synthetic weight (module receives W in __init__)
    W = jax.random.normal(k_w, (hidden_size, input_size), dtype=jnp.float32)

    for act in ("square", "relu", "erf"):
        y = jax.block_until_ready(committee_machine_forward(x, W, activation=act))
        y_ref = _reference(x, W, activation=act)
        assert y.shape == (batch,)
        # bf16-streamed inputs with f32 accumulation: ~1e-2-level agreement expected
        assert jnp.allclose(y, y_ref, atol=5e-2, rtol=5e-2), (act, y, y_ref)

    print("KERNEL_OK")
</pallas_src>

<mosaic_0001>
module attributes {stable_mosaic.version = 11 : i64} {
  func.func @_committee_kernel(%arg0: i32, %arg1: memref<24x32xbf16, #tpu.memory_space<vmem>>, %arg2: memref<32x16xbf16, #tpu.memory_space<vmem>>, %arg3: memref<24x1xf32, #tpu.memory_space<vmem>>) attributes {dimension_semantics = [#tpu.dimension_semantics<parallel>], iteration_bounds = array<i64: 1>, scalar_prefetch = 0 : i64, scratch_operands = 0 : i64, tpu.core_type = #tpu.core_type<tc>, window_params = [{transform_indices = @transform_0, window_bounds = array<i64: 24, 32>}, {pipeline_mode = #tpu.pipeline_mode<synchronous>, transform_indices = @transform_1, window_bounds = array<i64: 32, 16>}, {transform_indices = @transform_2, window_bounds = array<i64: 24, 1>}]} {
    %c0 = arith.constant 0 : index
    %c0_0 = arith.constant 0 : index
    %0 = vector.load %arg1[%c0, %c0_0] : memref<24x32xbf16, #tpu.memory_space<vmem>>, vector<24x32xbf16>
    %c0_1 = arith.constant 0 : index
    %c0_2 = arith.constant 0 : index
    %1 = vector.load %arg2[%c0_1, %c0_2] : memref<32x16xbf16, #tpu.memory_space<vmem>>, vector<32x16xbf16>
    %cst = arith.constant dense<0.000000e+00> : vector<24x16xf32>
    %2 = tpu.matmul %0, %1, %cst {dimension_numbers = #tpu.dot_dimension_numbers<[1], [0], [0], [1], [0, 0, 1, 1], [], []>} : vector<24x32xbf16>, vector<32x16xbf16>, vector<24x16xf32> -> vector<24x16xf32>
    %3 = arith.mulf %2, %2 : vector<24x16xf32>
    %cst_3 = arith.constant dense<0.000000e+00> : vector<24xf32>
    %4 = vector.multi_reduction <add>, %3, %cst_3 [1] : vector<24x16xf32> to vector<24xf32>
    %5 = vector.shape_cast %4 : vector<24xf32> to vector<24x1xf32>
    %cst_4 = arith.constant 0.001953125 : f32
    %6 = vector.broadcast %cst_4 : f32 to vector<24x1xf32>
    %7 = arith.mulf %5, %6 : vector<24x1xf32>
    %c0_5 = arith.constant 0 : index
    %c0_6 = arith.constant 0 : index
    %8 = vector.load %arg3[%c0_5, %c0_6] : memref<24x1xf32, #tpu.memory_space<vmem>>, vector<24x1xf32>
    tpu.vector_store %arg3[%c0_5, %c0_6], %7 {strides = array<i32>} : memref<24x1xf32, #tpu.memory_space<vmem>>, vector<24x1xf32>,
    return
  }
  func.func @transform_0(%arg0: i32) -> (i32, i32) {
    %c0_i32 = arith.constant 0 : i32
    %c0_i32_0 = arith.constant 0 : i32
    return %arg0, %c0_i32 : i32, i32
  }
  func.func @transform_1(%arg0: i32) -> (i32, i32) {
    %c0_i32 = arith.constant 0 : i32
    %c0_i32_0 = arith.constant 0 : i32
    %c0_i32_1 = arith.constant 0 : i32
    return %c0_i32, %c0_i32_0 : i32, i32
  }
  func.func @transform_2(%arg0: i32) -> (i32, i32) {
    %c0_i32 = arith.constant 0 : i32
    %c0_i32_0 = arith.constant 0 : i32
    return %arg0, %c0_i32 : i32, i32
  }
}

</mosaic_0001>

<bundles_post_ra>
// kernel: tpu_custom_call.1
= control target key start
LH: loop header
LB: loop body
LE: loop exit
PB: predicated region body
PF: predicated region fallthrough
CT: control target
= control target key end

     0   :  { %vm39_vm0 = vcmask 261120   ;;  %vm97_vm1 = vcmask 130048   ;;  %vm110_vm2 = vcmask 7168   ;;  %s176_s1 = inlined_call_operand.vmem [shape: bf16[32,16], index: 1, kind: input, shape index: {}]   ;;  %s177_s0 = inlined_call_operand.vmem [shape: bf16[24,32], index: 0, kind: input, shape index: {}]   ;;  %s178_s2 = inlined_call_operand.vmem [shape: f32[24,1], index: 2, kind: output, shape index: {}]  }
   0x1   :  { %v136_v0 = vld [vmem:[%s176_s1] sm:$0xff]   ;;  %v137_v1 = vld [vmem:[%s176_s1 + $0x8] sm:$0xff]  }
   0x2   :  { %128 = vmatprep.subr.bf16.mxu0 %v136_v0  ;;  %v138_v2 = vld [vmem:[%s177_s0] sm:$0xff]   ;;  %v139_v3 = vld [vmem:[%s177_s0 + $0x8] ss:$0 sps:$4 sm:$0xff]  }
   0x3   :  { %129 = vmatpush3.bf16.msra.mxu0 %v136_v0  ;;  %132 = vmatprep.mubr.msk.bf16.mxu0 %vm39_vm0, %v138_v2 }
   0x4   :  { %130 = vmatprep.subr.bf16.mxu0 %v137_v1 }
   0x7   :  { %131 = vmatpush3.bf16.msra.mxu0 %v137_v1 }
   0xa   :  { %133 = vmatmul.mubr.msk.bf16.vlgmr.msra.gmra.mrb[0].mxu0 %vm39_vm0, %v139_v3 }
  0xdd   :  { %v134_v4 = vpop.f32.mrb[0].mxu0 }
  0xde   :  { %v96_v5 = vmul.f32 %v134_v4, %v134_v4  ;;  %v80_v6 = vpop.f32.mrb[1].mxu0 }
  0xdf   :  { %v94_v7 = vmul.f32 %v80_v6, %v80_v6  ;;  %v135_v8 = vpop.f32.mrb[2].mxu0 }
  0xe0   :  { %v83_v9 = vpop.f32.mrb[3].mxu0  ;;  %v104_v10 = vsel %vm97_vm1, %v96_v5, 0.0 }
  0xe1   :  { %v95_v11 = vmul.f32 %v83_v9, %v83_v9  ;;  %105 = vadd.xlane.f32.xlu1 %v104_v10  ;;  %v98_v12 = vsel %vm97_vm1, %v94_v7, 0.0 }
  0xe2   :  { %99 = vadd.xlane.f32.xlu0 %v98_v12 }
  0xe3   :  { %v101_v13 = vsel %vm97_vm1, %v95_v11, 0.0 }
  0xe6   :  { %102 = vadd.xlane.f32.xlu0 %v101_v13 }
 0x16e   :  { %v106_v14 = vpop.xlane.xlu1 %105 }
 0x16f   :  { %v109_v15 = vmul.f32 0.001953125, %v106_v14  ;;  %v100_v16 = vpop.xlane.xlu0 %99 }
 0x170   :  { %v107_v17 = vmul.f32 0.001953125, %v100_v16 }
 0x171   :  { %113 = vst.msk [vmem:[%s178_s2 + $0x10] sm:$0xff] %vm110_vm2, %v109_v15 }
 0x172   :  { %111 = vst.msk [vmem:[%s178_s2] sm:$0xff] %vm110_vm2, %v107_v17 }
 0x173   :  { %v103_v18 = vpop.xlane.xlu0 %102 }
 0x174   :  { %v108_v19 = vmul.f32 0.001953125, %v103_v18 }
 0x176   :  { %112 = vst.msk [vmem:[%s178_s2 + $0x8] sm:$0xff] %vm110_vm2, %v108_v19 }

</bundles_post_ra>
